<compile_context>
chip_gen: v5e
topology: v5e:2x2
jax: 0.10.0
libtpu: 0.0.40
codegen_flags: <defaults>
</compile_context>

<pallas_src>
import functools

import jax
import jax.numpy as jnp
from jax.experimental import pallas as pl
from jax.experimental.pallas import tpu as pltpu


# ---------------------------------------------------------------------------
# Fused path: whole slab resident in VMEM (small inputs). One launch,
# 2N bytes of HBM traffic (one read + one write).
# ---------------------------------------------------------------------------
def _fused_center_kernel(x_ref, out_ref, mean_ref, *, inv_n):
    x = x_ref[...]
    # 1/n is a trace-time constant multiply, not a runtime divide.
    m = jnp.sum(x.astype(jnp.float32)) * jnp.float32(inv_n)
    mean_ref[0, 0] = m
    if jnp.issubdtype(x.dtype, jnp.floating):
        out_ref[...] = x - m.astype(x.dtype)
    else:
        out_ref[...] = (x.astype(jnp.float32) - m).astype(out_ref.dtype)


# ---------------------------------------------------------------------------
# Tiled path, phase 1: global sum -> mean across an "arbitrary" grid axis.
# Lane-parallel f32 partial sums in VMEM; cross-lane reduce only at the end.
# ---------------------------------------------------------------------------
def _mean_kernel(x_ref, mean_ref, acc_ref, *, inv_n):
    @pl.when(pl.program_id(0) == 0)
    def _():
        acc_ref[...] = jnp.zeros_like(acc_ref)

    # Per-lane adds only (VPU work, hidden under the tile DMA).
    acc_ref[...] += jnp.sum(
        x_ref[...].astype(jnp.float32), axis=0, keepdims=True)

    @pl.when(pl.program_id(0) == pl.num_programs(0) - 1)
    def _():
        mean_ref[0, 0] = jnp.sum(acc_ref[...]) * jnp.float32(inv_n)


# ---------------------------------------------------------------------------
# Tiled path, phase 2: elementwise subtract of the resident SMEM scalar mean.
# ---------------------------------------------------------------------------
def _center_kernel(mean_ref, x_ref, out_ref):
    m = mean_ref[0, 0]
    x = x_ref[...]
    if jnp.issubdtype(x.dtype, jnp.floating):
        out_ref[...] = x - m.astype(x.dtype)
    else:
        out_ref[...] = (x.astype(jnp.float32) - m).astype(out_ref.dtype)


def _pick_layout(total):
    """Choose a lane-dense (rows, lanes) reshape of the flattened input."""
    # Prefer a wide last dim (large multiple of 128) with sublane-aligned rows.
    for lanes in (1024, 512, 256, 128):
        if total % lanes == 0 and (total // lanes) % 8 == 0:
            return total // lanes, lanes
    # Any lane-aligned layout (fused / whole-block path tolerates odd rows).
    for lanes in (1024, 512, 256, 128):
        if total % lanes == 0:
            return total // lanes, lanes
    return None


def _min_sublane(dtype):
    """Minimum sublane multiple for clean tiling of this dtype."""
    itemsize = jnp.dtype(dtype).itemsize
    return max(8, 32 // itemsize)   # 8 for f32, 16 for bf16, 32 for int8


def _pick_tile_rows(rows, lanes, itemsize, sublane, target_bytes=2 << 20):
    """Largest divisor of rows that is a multiple of `sublane` and keeps the
    tile at <= target_bytes (~2 MiB: v7x-safe with double-buffering, ~85% of
    HBM roofline on v6e)."""
    cap = max(sublane, target_bytes // (lanes * itemsize))
    cap = min(rows, cap)
    cap = (cap // sublane) * sublane
    t = cap
    while t >= sublane:
        if rows % t == 0:
            return t
        t -= sublane
    return None


@jax.jit
def center_layer(x):
    """JAX equivalent of CenterLayer.forward: returns (x - x.mean(), mean)."""
    orig_shape = x.shape
    total = x.size
    itemsize = jnp.dtype(x.dtype).itemsize
    slab_bytes = total * itemsize
    inv_n = 1.0 / float(total)
    layout = _pick_layout(total)

    if layout is None:
        # Not expressible as a lane-aligned slab; use fused XLA.
        m = jnp.mean(x.astype(jnp.float32))
        return (x.astype(jnp.float32) - m).astype(x.dtype), m

    rows, lanes = layout
    x2d = x.reshape(rows, lanes)   # native dtype; no f32 round trip

    # ---- Fused single-pass path for slabs that fit VMEM (v7x-safe). ----
    FUSED_MAX_BYTES = 8 << 20      # x + out resident + f32 temps < ~32 MiB
    if slab_bytes <= FUSED_MAX_BYTES:
        out2d, mean2d = pl.pallas_call(
            functools.partial(_fused_center_kernel, inv_n=inv_n),
            out_shape=(jax.ShapeDtypeStruct((rows, lanes), x.dtype),
                       jax.ShapeDtypeStruct((1, 1), jnp.float32)),
            in_specs=[pl.BlockSpec(memory_space=pltpu.VMEM)],
            out_specs=(pl.BlockSpec(memory_space=pltpu.VMEM),
                       pl.BlockSpec(memory_space=pltpu.SMEM)),
            compiler_params=pltpu.CompilerParams(vmem_limit_bytes=48 << 20),
        )(x2d)
        # TODO(synk): torch prints X.mean() as a side effect; we return it.
        return out2d.reshape(orig_shape), mean2d[0, 0]

    # ---- Tiled two-phase path for large slabs. ----
    sublane = _min_sublane(x.dtype)
    tile_rows = _pick_tile_rows(rows, lanes, itemsize, sublane)
    if tile_rows is None:
        # No clean divisor; don't blow VMEM with a whole-array block.
        m = jnp.mean(x.astype(jnp.float32))
        return (x.astype(jnp.float32) - m).astype(x.dtype), m

    num_tiles = rows // tile_rows
    vmem_limit = 32 << 20          # safe on all gens; > v5e's 16 MiB default

    # Phase 1: reduce to the global mean (one (1,1) f32 SMEM output).
    mean2d = pl.pallas_call(
        functools.partial(_mean_kernel, inv_n=inv_n),
        out_shape=jax.ShapeDtypeStruct((1, 1), jnp.float32),
        grid=(num_tiles,),
        in_specs=[pl.BlockSpec((tile_rows, lanes), lambda i: (i, 0))],
        out_specs=pl.BlockSpec(memory_space=pltpu.SMEM),
        scratch_shapes=[pltpu.VMEM((1, lanes), jnp.float32)],
        compiler_params=pltpu.CompilerParams(
            dimension_semantics=("arbitrary",),
            vmem_limit_bytes=vmem_limit),
    )(x2d)

    # Phase 2: tiled subtract ("parallel" so v7x's two TCs split the pass).
    out2d = pl.pallas_call(
        _center_kernel,
        out_shape=jax.ShapeDtypeStruct((rows, lanes), x.dtype),
        grid=(num_tiles,),
        in_specs=[
            pl.BlockSpec(memory_space=pltpu.SMEM),               # mean
            pl.BlockSpec((tile_rows, lanes), lambda i: (i, 0)),  # x tile
        ],
        out_specs=pl.BlockSpec((tile_rows, lanes), lambda i: (i, 0)),
        compiler_params=pltpu.CompilerParams(
            dimension_semantics=("parallel",),
            vmem_limit_bytes=vmem_limit),
    )(mean2d, x2d)

    return out2d.reshape(orig_shape), mean2d[0, 0]


if __name__ == "__main__":
    key = jax.random.PRNGKey(0)
    x = jax.random.normal(key, (2, 4, 16, 16), dtype=jnp.float32)

    out, mean = center_layer(x)
    out = jax.block_until_ready(out)

    # Reference check against plain JAX.
    ref = x - jnp.mean(x)
    assert jnp.allclose(out, ref, atol=1e-5, rtol=1e-5), "mismatch vs reference"
    assert jnp.allclose(mean, jnp.mean(x), atol=1e-6, rtol=1e-5), "mean mismatch"

    print("KERNEL_OK")
</pallas_src>

<mosaic_0001>
module attributes {stable_mosaic.version = 11 : i64} {
  func.func @_fused_center_kernel(%arg0: memref<8x256xf32, #tpu.memory_space<vmem>>, %arg1: memref<8x256xf32, #tpu.memory_space<vmem>>, %arg2: memref<1x1xf32, #tpu.memory_space<smem>>) attributes {dimension_semantics = [], scalar_prefetch = 0 : i64, scratch_operands = 0 : i64, tpu.core_type = #tpu.core_type<tc>} {
    %c0 = arith.constant 0 : index
    %c0_0 = arith.constant 0 : index
    %0 = vector.load %arg0[%c0, %c0_0] : memref<8x256xf32, #tpu.memory_space<vmem>>, vector<8x256xf32>
    %1 = vector.shape_cast %0 : vector<8x256xf32> to vector<1x8x256xf32>
    %cst = arith.constant dense<0.000000e+00> : vector<1xf32>
    %2 = vector.multi_reduction <add>, %1, %cst [1, 2] : vector<1x8x256xf32> to vector<1xf32>
    %3 = vector.shape_cast %2 : vector<1xf32> to vector<1x1x1xf32>
    %4 = vector.extract %3[0, 0, 0] : f32 from vector<1x1x1xf32>
    %cst_1 = arith.constant 4.8828125E-4 : f32
    %5 = arith.mulf %4, %cst_1 : f32
    %c0_2 = arith.constant 0 : index
    %c0_3 = arith.constant 0 : index
    %6 = memref.load %arg2[%c0_2, %c0_3] : memref<1x1xf32, #tpu.memory_space<smem>>
    memref.store %5, %arg2[%c0_2, %c0_3] : memref<1x1xf32, #tpu.memory_space<smem>>
    %7 = vector.broadcast %5 : f32 to vector<8x256xf32>
    %8 = arith.subf %0, %7 : vector<8x256xf32>
    %c0_4 = arith.constant 0 : index
    %c0_5 = arith.constant 0 : index
    %9 = vector.load %arg1[%c0_4, %c0_5] : memref<8x256xf32, #tpu.memory_space<vmem>>, vector<8x256xf32>
    tpu.vector_store %arg1[%c0_4, %c0_5], %8 {strides = array<i32>} : memref<8x256xf32, #tpu.memory_space<vmem>>, vector<8x256xf32>,
    return
  }
}

</mosaic_0001>

<bundles_post_ra>
// kernel: center_layer.1
= control target key start
LH: loop header
LB: loop body
LE: loop exit
PB: predicated region body
PF: predicated region fallthrough
CT: control target
= control target key end

     0   :  { %s98_s0 = inlined_call_operand.vmem [shape: f32[8,256], index: 0, kind: input, shape index: {}]   ;;  %s99_s1 = inlined_call_operand.vmem [shape: f32[8,256], index: 1, kind: output, shape index: {0}]   ;;  %s100_s2 = inlined_call_operand.hbm [shape: f32[1,1], index: 2, kind: output, shape index: {1}]  }
   0x1   :  { %v11_v0 = vld [vmem:[%s98_s0] sm:$0xff]  ;;  %v12_v1 = vld [vmem:[%s98_s0 + $0x8] sm:$0xff] }
   0x2   :  { %8 = vsyncpa [#allocation3], 0  ;;  %v13_v2 = vadd.f32 %v12_v1, %v11_v0  ;;  %s38_s15 = sshll.u32 %s100_s2, 4  ;;  %s67_s0 = smov [#allocation2]   ;;  %s39_s15 = int_to_ptr.hbm [resolvable:$true] %s38_s15 }
   0x4   :  { %14 = vadd.xlane.f32.xlu0 %v13_v2 }
  0x77   :  { %v15_v3 = vpop.xlane.xlu0 %14 }
  0x78   :  { %v16_v4 = vrot.slane %v15_v3, 4 }
  0x7a   :  { %v17_v5 = vadd.f32 %v16_v4, %v15_v3 }
  0x7c   :  { %v18_v6 = vrot.slane %v17_v5, 2 }
  0x7e   :  { %v19_v7 = vadd.f32 %v18_v6, %v17_v5 }
  0x80   :  { %v20_v8 = vrot.slane %v19_v7, 1 }
  0x82   :  { %v21_v9 = vadd.f32 %v20_v8, %v19_v7 }
  0x84   :  { %50 = vpush %v21_v9 }
  0xb5   :  { %s51_s16 = spop %50 }
  0xb6   :  { %s23_s17 = smul.f32 0.00048828125, %s51_s16 }
  0xb8   :  { %25 = sst [smem:[#allocation2]] %s23_s17  ;;  %v26_v10 = vstv %s23_s17 }
  0xb9   :  { %v27_v11 = vsub.f32 %v11_v0, %v26_v10  ;;  %v28_v12 = vsub.f32 %v12_v1, %v26_v10  ;;  %41 = dma.smem_to_hbm %s67_s0, 16, %s39_s15, [#allocation3]  }
  0xbb   :  { %29 = vst [vmem:[%s99_s1] sm:$0xff] %v27_v11 }
  0xbc   :  { %30 = vst [vmem:[%s99_s1 + $0x8] sm:$0xff] %v28_v12 }
  0xbd   :  { %65 = dma.done.wait [#allocation3], 16  }
  0xbe   :  { %66 = vsyncadd [#allocation3], 4294967280 }
  0xbf   :  { %48 = sfence }
  0xc0   :  { %49 = vsyncpa [#allocation3], 1 }

</bundles_post_ra>
